<compile_context>
chip_gen: v6e
topology: v6e:2x2x1
jax: 0.10.0
libtpu: 0.0.40
codegen_flags: <defaults>
</compile_context>

<pallas_src>
import jax
import jax.numpy as jnp
from jax import lax
from jax.experimental import pallas as pl
from jax.experimental.pallas import tpu as pltpu


def _round_up(v, m):
    return ((v + m - 1) // m) * m


def _apply_act(y, act):
    if act == 'silu':
        # EUP exp + EUP approximate reciprocal: frees VALU issue slots.
        sig = pl.reciprocal(1.0 + jnp.exp(-y), approx=True)
        return y * sig
    elif act == 'relu':
        return jnp.maximum(y, 0.0)
    elif act == 'lrelu':
        return jnp.where(y >= 0.0, y, 0.1 * y)
    else:
        raise AttributeError('Unsupported act type: {}'.format(act))


def _make_baseconv_kernel(act):
    """One tile: (BM, K) @ (K, C_out_pad) -> folded BN -> activation -> store."""

    def kernel(x_ref, w_ref, scale_ref, shift_ref, o_ref):
        # x_ref:     (BM, K)          bf16 im2col patches (K = k*k*C_in)
        # w_ref:     (K, C_out_pad)   bf16 folded conv weights
        # scale_ref: (1, C_out_pad)   f32 folded BN scale
        # shift_ref: (1, C_out_pad)   f32 folded BN shift (includes conv bias)
        # o_ref:     (BM, C_out_pad)  lane-dense output tile
        acc = jnp.dot(x_ref[...], w_ref[...],
                      preferred_element_type=jnp.float32)
        y = acc * scale_ref[...] + shift_ref[...]          # eval-mode BatchNorm
        o_ref[...] = _apply_act(y, act).astype(o_ref.dtype)

    return kernel


def base_conv_forward(x, conv_w, bn_gamma, bn_beta, bn_mean, bn_var,
                      *, stride=1, eps=1e-5, act='silu', conv_bias=None,
                      compute_dtype=jnp.bfloat16, block_rows=256):
    """BaseConv.forward: act(bn(conv(x))).  x is NCHW, conv_w is OIHW."""
    N, C_in, H, W = x.shape
    C_out, C_in_w, k, k2 = conv_w.shape
    assert k == k2 and C_in_w == C_in, "groups != 1 not supported"

    p = (k - 1) // 2
    Hp, Wp = H + 2 * p, W + 2 * p
    H_out = (Hp - k) // stride + 1
    W_out = (Wp - k) // stride + 1

    # ---- Wrapper-side layout plumbing (no junk compute inside the kernel) ----
    # NCHW -> NHWC, zero-pad, then fold the k*k taps into the channel axis
    # (partial im2col): patches[n, h, w, (kh*k + kw)*C_in + c]
    #                   = x_pad[n, h*stride + kh, w*stride + kw, c]
    x_nhwc = jnp.transpose(x, (0, 2, 3, 1))
    x_pad = jnp.pad(x_nhwc, ((0, 0), (p, p), (p, p), (0, 0)))
    cols = []
    for kh in range(k):
        for kw in range(k):
            cols.append(x_pad[:,
                              kh: kh + stride * (H_out - 1) + 1: stride,
                              kw: kw + stride * (W_out - 1) + 1: stride,
                              :])
    K = k * k * C_in
    patches = jnp.concatenate(cols, axis=-1)                 # (N, H_out, W_out, K)
    M = H_out * W_out
    patches = patches.reshape(N, M, K).astype(compute_dtype)

    # Row-block tiling (second grid axis): pad M to a multiple of the block.
    block_rows = max(16, _round_up(block_rows, 16))
    BM = min(block_rows, _round_up(M, 16))
    M_pad = _round_up(M, BM)
    if M_pad > M:
        patches = jnp.pad(patches, ((0, 0), (0, M_pad - M), (0, 0)))

    # Weights: OIHW -> HWIO -> (K, C_out), lane-pad C_out to a multiple of 128.
    C_out_pad = _round_up(C_out, 128)
    w_fold = jnp.transpose(conv_w, (2, 3, 1, 0)).reshape(K, C_out)
    if C_out_pad > C_out:
        w_fold = jnp.pad(w_fold, ((0, 0), (0, C_out_pad - C_out)))
    w_fold = w_fold.astype(compute_dtype)

    # Fold eval-mode BatchNorm (and optional conv bias) into per-channel affine.
    inv_std = 1.0 / jnp.sqrt(bn_var.astype(jnp.float32) + eps)
    scale = bn_gamma.astype(jnp.float32) * inv_std
    bias = jnp.zeros((C_out,), jnp.float32) if conv_bias is None else conv_bias
    shift = (bn_beta.astype(jnp.float32)
             + (bias.astype(jnp.float32) - bn_mean.astype(jnp.float32)) * scale)
    scale = jnp.pad(scale, (0, C_out_pad - C_out)).reshape(1, C_out_pad)
    shift = jnp.pad(shift, (0, C_out_pad - C_out)).reshape(1, C_out_pad)

    # ---- VMEM budget & cost hints ----
    cbytes = jnp.dtype(compute_dtype).itemsize
    obytes = jnp.dtype(x.dtype).itemsize
    tile_bytes = (2 * BM * K * cbytes                 # double-buffered input tile
                  + 2 * BM * C_out_pad * obytes       # double-buffered output tile
                  + 2 * K * C_out_pad * cbytes        # weights (conservative x2)
                  + 4 * C_out_pad * 4)                # scale/shift
    vmem_limit = int(min(64 * 1024 * 1024,
                         max(16 * 1024 * 1024, 2 * tile_bytes + (4 << 20))))

    cost = pl.CostEstimate(
        flops=2 * N * H_out * W_out * k * k * C_in * C_out,
        transcendentals=(N * H_out * W_out * C_out) if act == 'silu' else 0,
        bytes_accessed=int(patches.size * cbytes + w_fold.size * cbytes
                           + N * M * C_out * obytes))

    kernel = _make_baseconv_kernel(act)

    out_pad = pl.pallas_call(
        kernel,
        out_shape=jax.ShapeDtypeStruct((N, M_pad, C_out_pad), x.dtype),
        grid=(N, M_pad // BM),
        in_specs=[
            pl.BlockSpec((None, BM, K), lambda n, m: (n, m, 0)),        # patches tile
            pl.BlockSpec((K, C_out_pad), lambda n, m: (0, 0)),          # weights resident
            pl.BlockSpec((1, C_out_pad), lambda n, m: (0, 0)),          # BN scale
            pl.BlockSpec((1, C_out_pad), lambda n, m: (0, 0)),          # BN shift
        ],
        out_specs=pl.BlockSpec((None, BM, C_out_pad), lambda n, m: (n, m, 0)),
        compiler_params=pltpu.CompilerParams(
            dimension_semantics=("parallel", "parallel"),
            vmem_limit_bytes=vmem_limit),
        cost_estimate=cost,
    )(patches, w_fold, scale, shift)

    # Drop row/channel padding, restore NCHW to match the PyTorch module.
    out = out_pad[:, :M, :C_out].reshape(N, H_out, W_out, C_out)
    return jnp.transpose(out, (0, 3, 1, 2))


if __name__ == "__main__":
    key = jax.random.PRNGKey(0)
    kx, kw, kg, kb, km, kv = jax.random.split(key, 6)

    N, C_in, H, W = 2, 8, 16, 16
    C_out, ksize, stride = 32, 3, 1
    eps = 1e-5

    x = jax.random.normal(kx, (N, C_in, H, W), dtype=jnp.float32)
    conv_w = 0.1 * jax.random.normal(kw, (C_out, C_in, ksize, ksize),
                                     dtype=jnp.float32)
    gamma = 1.0 + 0.1 * jax.random.normal(kg, (C_out,), dtype=jnp.float32)
    beta = 0.1 * jax.random.normal(kb, (C_out,), dtype=jnp.float32)
    running_mean = 0.1 * jax.random.normal(km, (C_out,), dtype=jnp.float32)
    running_var = jax.random.uniform(kv, (C_out,), dtype=jnp.float32,
                                     minval=0.5, maxval=1.5)

    out = base_conv_forward(x, conv_w, gamma, beta, running_mean, running_var,
                            stride=stride, eps=eps, act='silu')
    out = jax.block_until_ready(out)

    # Pure-JAX reference: conv -> eval-mode BN -> SiLU (f32, HIGHEST precision).
    p = (ksize - 1) // 2
    ref = lax.conv_general_dilated(
        x, conv_w, window_strides=(stride, stride),
        padding=((p, p), (p, p)),
        dimension_numbers=('NCHW', 'OIHW', 'NCHW'),
        precision=lax.Precision.HIGHEST)
    s = gamma / jnp.sqrt(running_var + eps)
    ref = ref * s[None, :, None, None] + (beta - running_mean * s)[None, :, None, None]
    ref = ref * jax.nn.sigmoid(ref)

    assert out.shape == ref.shape == (N, C_out, H, W)
    assert out.dtype == ref.dtype
    max_err = float(jnp.max(jnp.abs(out - ref)))
    # bf16 operands with f32 accumulation (+ approx-reciprocal sigmoid):
    # tolerance loosened vs. the all-f32 reference, per the perf review.
    assert jnp.allclose(out, ref, atol=5e-2, rtol=5e-2), max_err

    print("KERNEL_OK")
</pallas_src>

<mosaic_0001>
module attributes {stable_mosaic.version = 11 : i64} {
  func.func @kernel(%arg0: i32, %arg1: i32, %arg2: memref<1x256x72xbf16, #tpu.memory_space<vmem>>, %arg3: memref<72x128xbf16, #tpu.memory_space<vmem>>, %arg4: memref<1x128xf32, #tpu.memory_space<vmem>>, %arg5: memref<1x128xf32, #tpu.memory_space<vmem>>, %arg6: memref<1x256x128xf32, #tpu.memory_space<vmem>>) attributes {dimension_semantics = [#tpu.dimension_semantics<parallel>, #tpu.dimension_semantics<parallel>], iteration_bounds = array<i64: 2, 1>, scalar_prefetch = 0 : i64, scratch_operands = 0 : i64, tpu.core_type = #tpu.core_type<tc>, window_params = [{transform_indices = @transform_0, window_bounds = array<i64: 1, 256, 72>}, {pipeline_mode = #tpu.pipeline_mode<synchronous>, transform_indices = @transform_1, window_bounds = array<i64: 72, 128>}, {pipeline_mode = #tpu.pipeline_mode<synchronous>, transform_indices = @transform_2, window_bounds = array<i64: 1, 128>}, {pipeline_mode = #tpu.pipeline_mode<synchronous>, transform_indices = @transform_3, window_bounds = array<i64: 1, 128>}, {transform_indices = @transform_4, window_bounds = array<i64: 1, 256, 128>}]} {
    %c0 = arith.constant 0 : index
    %c0_0 = arith.constant 0 : index
    %c0_1 = arith.constant 0 : index
    %0 = vector.load %arg2[%c0, %c0_0, %c0_1] : memref<1x256x72xbf16, #tpu.memory_space<vmem>>, vector<1x256x72xbf16>
    %1 = vector.shape_cast %0 : vector<1x256x72xbf16> to vector<256x72xbf16>
    %c0_2 = arith.constant 0 : index
    %c0_3 = arith.constant 0 : index
    %2 = vector.load %arg3[%c0_2, %c0_3] : memref<72x128xbf16, #tpu.memory_space<vmem>>, vector<72x128xbf16>
    %cst = arith.constant dense<0.000000e+00> : vector<256x128xf32>
    %3 = tpu.matmul %1, %2, %cst {dimension_numbers = #tpu.dot_dimension_numbers<[1], [0], [0], [1], [0, 0, 1, 1], [], []>} : vector<256x72xbf16>, vector<72x128xbf16>, vector<256x128xf32> -> vector<256x128xf32>
    %c0_4 = arith.constant 0 : index
    %c0_5 = arith.constant 0 : index
    %4 = vector.load %arg4[%c0_4, %c0_5] : memref<1x128xf32, #tpu.memory_space<vmem>>, vector<1x128xf32>
    %5 = vector.broadcast %4 : vector<1x128xf32> to vector<256x128xf32>
    %6 = arith.mulf %3, %5 : vector<256x128xf32>
    %c0_6 = arith.constant 0 : index
    %c0_7 = arith.constant 0 : index
    %7 = vector.load %arg5[%c0_6, %c0_7] : memref<1x128xf32, #tpu.memory_space<vmem>>, vector<1x128xf32>
    %8 = vector.broadcast %7 : vector<1x128xf32> to vector<256x128xf32>
    %9 = arith.addf %6, %8 : vector<256x128xf32>
    %cst_8 = arith.constant 0.000000e+00 : f32
    %10 = vector.broadcast %cst_8 : f32 to vector<256x128xf32>
    %11 = arith.subf %10, %9 : vector<256x128xf32>
    %12 = math.exp %11 : vector<256x128xf32>
    %cst_9 = arith.constant 1.000000e+00 : f32
    %13 = vector.broadcast %cst_9 : f32 to vector<256x128xf32>
    %14 = arith.addf %13, %12 : vector<256x128xf32>
    %15 = tpu.reciprocal %14 {approx = true} : vector<256x128xf32> -> vector<256x128xf32>
    %16 = arith.mulf %9, %15 : vector<256x128xf32>
    %c0_10 = arith.constant 0 : index
    %c0_11 = arith.constant 0 : index
    %c0_12 = arith.constant 0 : index
    %17 = vector.load %arg6[%c0_10, %c0_11, %c0_12] : memref<1x256x128xf32, #tpu.memory_space<vmem>>, vector<1x256x128xf32>
    %18 = vector.shape_cast %17 : vector<1x256x128xf32> to vector<256x128xf32>
    %19 = vector.shape_cast %16 : vector<256x128xf32> to vector<1x256x128xf32>
    tpu.vector_store %arg6[%c0_10, %c0_11, %c0_12], %19 {strides = array<i32>} : memref<1x256x128xf32, #tpu.memory_space<vmem>>, vector<1x256x128xf32>,
    return
  }
  func.func @transform_0(%arg0: i32, %arg1: i32) -> (i32, i32, i32) {
    %c0_i32 = arith.constant 0 : i32
    %c0_i32_0 = arith.constant 0 : i32
    return %arg0, %arg1, %c0_i32 : i32, i32, i32
  }
  func.func @transform_1(%arg0: i32, %arg1: i32) -> (i32, i32) {
    %c0_i32 = arith.constant 0 : i32
    %c0_i32_0 = arith.constant 0 : i32
    %c0_i32_1 = arith.constant 0 : i32
    return %c0_i32, %c0_i32_0 : i32, i32
  }
  func.func @transform_2(%arg0: i32, %arg1: i32) -> (i32, i32) {
    %c0_i32 = arith.constant 0 : i32
    %c0_i32_0 = arith.constant 0 : i32
    %c0_i32_1 = arith.constant 0 : i32
    return %c0_i32, %c0_i32_0 : i32, i32
  }
  func.func @transform_3(%arg0: i32, %arg1: i32) -> (i32, i32) {
    %c0_i32 = arith.constant 0 : i32
    %c0_i32_0 = arith.constant 0 : i32
    %c0_i32_1 = arith.constant 0 : i32
    return %c0_i32, %c0_i32_0 : i32, i32
  }
  func.func @transform_4(%arg0: i32, %arg1: i32) -> (i32, i32, i32) {
    %c0_i32 = arith.constant 0 : i32
    %c0_i32_0 = arith.constant 0 : i32
    return %arg0, %arg1, %c0_i32 : i32, i32, i32
  }
}

</mosaic_0001>

<bundles_post_ra>
// kernel: tpu_custom_call.1
= control target key start
LH: loop header
LB: loop body
LE: loop exit
PB: predicated region body
PF: predicated region fallthrough
CT: control target
= control target key end

     0   :  { %9 = vsyncpa [#allocation3], 0  ;;  %s1835_s0 = inlined_call_operand.vmem [shape: bf16[2,256,72], index: 0, kind: input, shape index: {}]   ;;  %s1836_s1 = inlined_call_operand.vmem [shape: bf16[72,128], index: 1, kind: input, shape index: {}]   ;;  %s1837_s2 = inlined_call_operand.vmem [shape: f32[1,128], index: 2, kind: input, shape index: {}]   ;;  %s1838_s3 = inlined_call_operand.vmem [shape: f32[1,128], index: 3, kind: input, shape index: {}]   ;;  %s1839_s4 = inlined_call_operand.hbm [shape: f32[2,256,128], index: 4, kind: output, shape index: {}]  }
   0x1   :  { %11 = vsyncpa [#allocation3 + $0x1], 0  ;;  %s1428_s15 = smov 0   ;;  %s1430_s16 = smov 0  }
   0x2   :  { %s1432_s17 = smov 0   ;;  %s1434_s18 = smov 0  }
   0x3   :  { %s1436_s19 = smov 0   ;;  %s1438_s20 = smov 0  }
   0x4 LB: > { %s987_s21 = sadd.s32 4294967295, %s1398_s20   ;;  %s988_s22 = sadd.s32 4294967294, %s1398_s20   ;;  %s1398_s20 = sphi %s1438_s20, %s17_s20   ;;  %s1394_s19 = sphi %s1436_s19, %s1846_s19   ;;  %s1390_s18 = sphi %s1434_s18, %s1845_s18   ;;  %s1386_s17 = sphi %s1432_s17, %s1844_s17   ;;  %s1382_s16 = sphi %s1430_s16, %s1843_s16   ;;  %s1378_s15 = sphi %s1428_s15, %s1842_s15  }
   0x5   : > { %s29_s23 = sadd.s32 1, %s1394_s19  ;;  %s129_s24 = sadd.s32 1, %s1386_s17 }
   0x6   : > { %p31_p0 = scmp.ge.s32.totalorder %s29_s23, 2  ;;  %p139_p1 = scmp.ne.s32.totalorder %s1386_s17, %s1382_s16 }
   0x7   : > { %p140_p2 = scmp.eq.s32.totalorder %s987_s21, 1  ;;  %p145_p3 = scmp.ne.s32.totalorder %s1382_s16, %s1378_s15 }
   0x8   : > { %s1848_s23 = smov (%p31_p0, %s29_s23), 0  ;;  %p146_p5 = scmp.eq.s32.totalorder %s988_s22, 1 }
   0x9   : > { %p1468_p4 = por %p140_p2, %p139_p1  ;;  %s124_s26 = ssub.s32 %s1394_s19, %s1848_s23 }
   0xa   : > { %p991_p6 = scmp.ge.s32.totalorder %s1398_s20, 1  ;;  %p127_p7 = scmp.eq.s32.totalorder %s124_s26, 0 }
   0xb   : > { %p1475_p8 = por %p146_p5, %p145_p3  ;;  %p186_p9 = scmp.lt.s32.totalorder %s1398_s20, 3 }
   0xc   : > { %s1481_s28 = scalar_select %p127_p7, %s1386_s17, %s129_s24  }
   0xd   : > { %p187_p10 = pnand %p991_p6, %p186_p9 }
   0xe   : > { %p217_p11 = scmp.lt.s32.totalorder (!%p187_p10), %s1390_s18, 1  ;;  %s213_s6 = sand.u32 (!%p187_p10), 1, %s1382_s16  }
   0xf   : > { %190 = sbr.rel (%p187_p10) target bundleno = 348 (0x15c), region = 36  ;;  %s1665_s7 = sshll.u32 (!%p187_p10), %s213_s6, 8 }
  0x10   : > { %s1684_s8 = scalar_lea.vmem (!%p187_p10), [#allocation2], %s1665_s7 }
  0x14   : > { %v1173_v0 = vld [vmem:[%s1836_s1 + $0x20] ss:$0 sps:$4 sm:$0xff]   ;;  %vm425_vm0 = vcmask 1043456   ;;  %v1174_v1 = vld [vmem:[%s1836_s1 + $0x18] sm:$0xff]   ;;  %v1175_v3 = vld [vmem:[%s1836_s1 + $0x10] sm:$0xff]   ;;  %s218_s9 = scalar_select %p217_p11, %s1390_s18, 1 }
  0x15   : > { %1114 = vmatprep.subr.msk.bf16.mxu0 %vm425_vm0, %v1173_v0  ;;  %1115 = vmatprep.subr.msk.bf16.mxu1 %vm425_vm0, %v1173_v0  ;;  %v427_v2 = vsel %vm425_vm0, %v1173_v0, 0  ;;  %v1176_v4 = vld [vmem:[%s1836_s1 + $0x8] sm:$0xff]   ;;  %vm376_vm1 = vcmask 588800   ;;  %v1177_v7 = vld [vmem:[%s1836_s1] sm:$0xff]  }
  0x16   : > { %1063 = vmatpush3.bf16.msra.mxu0 %v427_v2  ;;  %1109 = vmatpush3.bf16.msra.mxu1 %v427_v2  ;;  %s1039_s10 = sshll.u32 %s218_s9, 7  ;;  %v1540_v22 = vld [vmem:[%s1837_s2] ss:$0 sm:$0xff]  ;;  %s1040_s9 = sshll.u32 %s1390_s18, 12 }
  0x17   : > { %1064 = vmatprep.subr.bf16.mxu0 %v1174_v1  ;;  %1105 = vmatprep.subr.bf16.mxu1 %v1174_v1  ;;  %s1500_s21 = scalar_lea.vmem %s1835_s0, %s1039_s10  ;;  %v1545_v24 = vld [vmem:[%s1838_s3] ss:$0 sm:$0xff]  ;;  %s908_s10 = sshll.u32 %s1684_s8, 4  ;;  %s1783_s10 = int_to_ptr.vmem [resolvable:$true] %s908_s10 }
  0x18   : > { %v1178_v5 = vld [vmem:[%s1500_s21] sm:$0xff]   ;;  %v1180_v8 = vld [vmem:[%s1500_s21 + $0x8] sm:$0xff]   ;;  %v1182_v10 = vld [vmem:[%s1500_s21 + $0x10] sm:$0xff]   ;;  %s1781_s13 = scalar_lea.hbm %s1839_s4, %s1040_s9  ;;  %s1790_s18 = scalar_lea.sflag [#allocation3], %s213_s6 }
  0x19   : > { %v1179_v6 = vld [vmem:[%s1500_s21 + $0x40] sm:$0xff]   ;;  %1072 = vmatprep.mubr.msk.bf16.mxu0 %vm376_vm1, %v1178_v5  ;;  %v1181_v9 = vld [vmem:[%s1500_s21 + $0x48] sm:$0xff]   ;;  %v1183_v11 = vld [vmem:[%s1500_s21 + $0x50] sm:$0xff]   ;;  %s1322_s14 = scalar_lea.vmem %s1783_s10, 4096 }
  0x1a   : > { %1065 = vmatpush3.bf16.msra.mxu0 %v1174_v1  ;;  %1110 = vmatpush3.bf16.msra.mxu1 %v1174_v1  ;;  %v1184_v12 = vld [vmem:[%s1500_s21 + $0x18] sm:$0xff]   ;;  %v1186_v14 = vld [vmem:[%s1500_s21 + $0x20] sm:$0xff]   ;;  %v1188_v16 = vld [vmem:[%s1500_s21 + $0x28] sm:$0xff]   ;;  %p1323_p12 = scmp.ne.s32.totalorder %s1783_s10, %s1322_s14 }
  0x1b   : > { %1066 = vmatprep.subr.bf16.mxu0 %v1175_v3  ;;  %1106 = vmatprep.subr.bf16.mxu1 %v1175_v3  ;;  %v1185_v13 = vld [vmem:[%s1500_s21 + $0x58] sm:$0xff]   ;;  %v1187_v15 = vld [vmem:[%s1500_s21 + $0x60] sm:$0xff]   ;;  %v1189_v17 = vld [vmem:[%s1500_s21 + $0x68] sm:$0xff]  }
  0x1c   : > { %1088 = vmatprep.mubr.msk.bf16.mxu1 %vm376_vm1, %v1179_v6  ;;  %v1190_v18 = vld [vmem:[%s1500_s21 + $0x30] sm:$0xff]   ;;  %v1192_v20 = vld [vmem:[%s1500_s21 + $0x38] sm:$0xff]   ;;  %p1324_p13 = pnand %p1323_p12, %p1468_p4 }
  0x1d   : > { %v1191_v19 = vld [vmem:[%s1500_s21 + $0x70] sm:$0xff]   ;;  %v1193_v21 = vld [vmem:[%s1500_s21 + $0x78] sm:$0xff]   ;;  %s1400_s21 = smov [#allocation2]  }
  0x1e   : > { %1067 = vmatpush3.bf16.msra.mxu0 %v1175_v3  ;;  %1111 = vmatpush3.bf16.msra.mxu1 %v1175_v3  ;;  %p1325_p0 = pneg %p1324_p13  ;;  %s1326_s22 = sshll.u32 %s1400_s21, 4  ;;  %s1327_s22 = int_to_ptr.vmem [resolvable:$false] %s1326_s22 }
  0x1f   : > { %1068 = vmatprep.subr.bf16.mxu0 %v1176_v4  ;;  %1107 = vmatprep.subr.bf16.mxu1 %v1176_v4  ;;  %s1328_s24 = scalar_lea.vmem %s1327_s22, 8192  ;;  %p1329_p1 = scmp.lt.s32.totalorder %s1783_s10, %s1327_s22 }
  0x20   : > { %p1330_p2 = scmp.lt.s32.totalorder %s1328_s24, %s1322_s14 }
  0x22   : > { %1069 = vmatpush3.bf16.msra.mxu0 %v1176_v4  ;;  %1112 = vmatpush3.bf16.msra.mxu1 %v1176_v4  ;;  %p1331_p3 = por %p1330_p2, %p1329_p1 }
  0x23   : > { %1070 = vmatprep.subr.bf16.mxu0 %v1177_v7  ;;  %1108 = vmatprep.subr.bf16.mxu1 %v1177_v7 }
  0x24   : > { %p1332_p5 = pnand %p1331_p3, %p1325_p0 }
  0x26   : > { %1071 = vmatpush3.bf16.msra.mxu0 %v1177_v7  ;;  %1113 = vmatpush3.bf16.msra.mxu1 %v1177_v7 }
  0x29   : > { %1073 = vmatmul.mubr.msk.bf16.vlgmr.msra.gmra.mxu0 %vm376_vm1, %v1180_v8  ;;  %1089 = vmatmul.mubr.msk.bf16.vlgmr.msra.gmra.mxu1 %vm376_vm1, %v1181_v9 }
  0x2a   : > { %1076 = vmatprep.mubr.msk.bf16.mxu0 %vm376_vm1, %v1182_v10  ;;  %1092 = vmatprep.mubr.msk.bf16.mxu1 %vm376_vm1, %v1183_v11 }
  0x31   : > { %1077 = vmatmul.mubr.msk.bf16.gmra.mxu0 %vm376_vm1, %v1184_v12  ;;  %1093 = vmatmul.mubr.msk.bf16.gmra.mxu1 %vm376_vm1, %v1185_v13 }
  0x32   : > { %1080 = vmatprep.mubr.msk.bf16.mxu0 %vm376_vm1, %v1186_v14  ;;  %1096 = vmatprep.mubr.msk.bf16.mxu1 %vm376_vm1, %v1187_v15 }
  0x39   : > { %1081 = vmatmul.mubr.msk.bf16.gmra.mxu0 %vm376_vm1, %v1188_v16  ;;  %1097 = vmatmul.mubr.msk.bf16.gmra.mxu1 %vm376_vm1, %v1189_v17 }
  0x3a   : > { %1084 = vmatprep.mubr.msk.bf16.mxu0 %vm376_vm1, %v1190_v18  ;;  %1100 = vmatprep.mubr.msk.bf16.mxu1 %vm376_vm1, %v1191_v19 }
  0x41   : > { %1085 = vmatmul.mubr.msk.bf16.gmra.mxu0 %vm376_vm1, %v1192_v20  ;;  %1101 = vmatmul.mubr.msk.bf16.gmra.mxu1 %vm376_vm1, %v1193_v21 }
  0xe9   : > { %v1074_v23 = vpop.f32.mrf.mxu0  ;;  %v1090_v25 = vpop.f32.mrf.mxu1 }
  0xea   : > { %v599_v26 = vmul.f32 %v1074_v23, %v1540_v22  ;;  %v615_v27 = vmul.f32 %v1090_v25, %v1540_v22 }
  0xeb   : > { %v463_v28 = vpop.f32.mrf.mxu0  ;;  %v527_v29 = vpop.f32.mrf.mxu1 }
  0xec   : > { %v1550_v30 = vadd.f32 %v1545_v24, %v599_v26  ;;  %v1553_v31 = vadd.f32 %v1545_v24, %v615_v27  ;;  %v597_v32 = vmul.f32 %v1540_v22, %v463_v28  ;;  %v613_v33 = vmul.f32 %v1540_v22, %v527_v29 }
  0xed   : > { %v1075_v34 = vpop.f32.mrf.mxu0  ;;  %v1091_v35 = vpop.f32.mrf.mxu1 }
  0xee   : > { %v670_v36 = vsub.f32 0.0, %v1550_v30  ;;  %v686_v37 = vsub.f32 0.0, %v1553_v31  ;;  %v1560_v38 = vadd.f32 %v1545_v24, %v597_v32  ;;  %v1563_v39 = vadd.f32 %v1545_v24, %v613_v33 }
  0xef   : > { %v600_v40 = vmul.f32 %v1075_v34, %v1540_v22  ;;  %v616_v41 = vmul.f32 %v1091_v35, %v1540_v22  ;;  %v466_v42 = vpop.f32.mrf.mxu0  ;;  %v530_v43 = vpop.f32.mrf.mxu1 }
  0xf0   : > { %v704_v44 = vmul.f32 1.442695, %v670_v36  ;;  %v736_v45 = vmul.f32 1.442695, %v686_v37  ;;  %v668_v46 = vsub.f32 0.0, %v1560_v38  ;;  %v684_v47 = vsub.f32 0.0, %v1563_v39 }
  0xf1   : > { %v1570_v48 = vadd.f32 %v1545_v24, %v600_v40  ;;  %v1573_v49 = vadd.f32 %v1545_v24, %v616_v41  ;;  %v598_v50 = vmul.f32 %v1540_v22, %v466_v42  ;;  %v614_v51 = vmul.f32 %v1540_v22, %v530_v43  ;;  %v1078_v52 = vpop.f32.mrf.mxu0  ;;  %v1094_v53 = vpop.f32.mrf.mxu1 }
  0xf2   : > { %1194 = vpow2.f32 %v704_v44  ;;  %v700_v54 = vmul.f32 1.442695, %v668_v46  ;;  %v732_v55 = vmul.f32 1.442695, %v684_v47  ;;  %v603_v56 = vmul.f32 %v1078_v52, %v1540_v22 }
  0xf3   : > { %1196 = vpow2.f32 %v736_v45  ;;  %v671_v57 = vsub.f32 0.0, %v1570_v48  ;;  %v687_v58 = vsub.f32 0.0, %v1573_v49  ;;  %v1581_v59 = vadd.f32 %v1545_v24, %v598_v50  ;;  %v479_v60 = vpop.f32.mrf.mxu0  ;;  %v543_v61 = vpop.f32.mrf.mxu1 }
  0xf4   : > { %1198 = vpow2.f32 %v700_v54  ;;  %v1584_v62 = vadd.f32 %v1545_v24, %v614_v51  ;;  %v1587_v63 = vadd.f32 %v1545_v24, %v603_v56  ;;  %v619_v0 = vmul.f32 %v1094_v53, %v1540_v22 }
  0xf5   : > { %1200 = vpow2.f32 %v732_v55  ;;  %v706_v1 = vmul.f32 1.442695, %v671_v57  ;;  %v738_v2 = vmul.f32 1.442695, %v687_v58  ;;  %v669_v3 = vsub.f32 0.0, %v1581_v59  ;;  %v1079_v4 = vpop.f32.mrf.mxu0  ;;  %v1095_v5 = vpop.f32.mrf.mxu1 }
  0xf6   : > { %v685_v6 = vsub.f32 0.0, %v1584_v62  ;;  %v674_v7 = vsub.f32 0.0, %v1587_v63  ;;  %v1594_v8 = vadd.f32 %v1545_v24, %v619_v0  ;;  %v601_v9 = vmul.f32 %v1540_v22, %v479_v60 }
  0xf7   : > { %1202 = vpow2.f32 %v706_v1  ;;  %v702_v10 = vmul.f32 1.442695, %v669_v3  ;;  %v617_v11 = vmul.f32 %v1540_v22, %v543_v61  ;;  %v604_v12 = vmul.f32 %v1079_v4, %v1540_v22  ;;  %v482_v13 = vpop.f32.mrf.mxu0  ;;  %v546_v14 = vpop.f32.mrf.mxu1 }
  0xf8   : > { %1204 = vpow2.f32 %v738_v2  ;;  %v734_v15 = vmul.f32 1.442695, %v685_v6  ;;  %v712_v16 = vmul.f32 1.442695, %v674_v7  ;;  %v690_v17 = vsub.f32 0.0, %v1594_v8 }
  0xf9   : > { %1206 = vpow2.f32 %v702_v10  ;;  %v1601_v18 = vadd.f32 %v1545_v24, %v601_v9  ;;  %v1604_v19 = vadd.f32 %v1545_v24, %v617_v11  ;;  %v1607_v20 = vadd.f32 %v1545_v24, %v604_v12  ;;  %v1082_v21 = vpop.f32.mrf.mxu0  ;;  %v1098_v23 = vpop.f32.mrf.mxu1 }
  0xfa   : > { %1208 = vpow2.f32 %v734_v15  ;;  %v744_v25 = vmul.f32 1.442695, %v690_v17  ;;  %v620_v26 = vmul.f32 %v1095_v5, %v1540_v22  ;;  %v602_v27 = vmul.f32 %v1540_v22, %v482_v13 }
  0xfb   : > { %1210 = vpow2.f32 %v712_v16  ;;  %v672_v28 = vsub.f32 0.0, %v1601_v18  ;;  %v688_v29 = vsub.f32 0.0, %v1604_v19  ;;  %v675_v32 = vsub.f32 0.0, %v1607_v20  ;;  %v495_v36 = vpop.f32.mrf.mxu0  ;;  %v559_v43 = vpop.f32.mrf.mxu1 }
  0xfc   : > { %1212 = vpow2.f32 %v744_v25  ;;  %v1615_v33 = vadd.f32 %v1545_v24, %v620_v26  ;;  %v1618_v34 = vadd.f32 %v1545_v24, %v602_v27  ;;  %v618_v35 = vmul.f32 %v1540_v22, %v546_v14 }
  0xfd   : > { %v708_v37 = vmul.f32 1.442695, %v672_v28  ;;  %v740_v40 = vmul.f32 1.442695, %v688_v29  ;;  %v714_v41 = vmul.f32 1.442695, %v675_v32  ;;  %v607_v42 = vmul.f32 %v1082_v21, %v1540_v22  ;;  %v1083_v55 = vpop.f32.mrf.mxu0  ;;  %v1099_v60 = vpop.f32.mrf.mxu1 }
  0xfe   : > { %v691_v44 = vsub.f32 0.0, %v1615_v33  ;;  %v1624_v45 = vadd.f32 %v1545_v24, %v618_v35  ;;  %v673_v47 = vsub.f32 0.0, %v1618_v34  ;;  %v623_v50 = vmul.f32 %v1098_v23, %v1540_v22 }
  0xff   : > { %v1195_v46 = vpop.eup %1194  ;;  %1214 = vpow2.f32 %v708_v37  ;;  %v1629_v53 = vadd.f32 %v1545_v24, %v607_v42  ;;  %v605_v54 = vmul.f32 %v1540_v22, %v495_v36  ;;  %v621_v58 = vmul.f32 %v1540_v22, %v559_v43  ;;  %v498_v10 = vpop.f32.mrf.mxu0 }
 0x100   : > { %v1197_v51 = vpop.eup %1196  ;;  %v766_v52 = vadd.f32 1.0, %v1195_v46  ;;  %1216 = vpow2.f32 %v740_v40  ;;  %v746_v1 = vmul.f32 1.442695, %v691_v44  ;;  %v689_v2 = vsub.f32 0.0, %v1624_v45  ;;  %v562_v15 = vpop.f32.mrf.mxu1 }
 0x101   : > { %v1199_v56 = vpop.eup %1198  ;;  %v782_v57 = vadd.f32 1.0, %v1197_v51  ;;  %1218 = vpow2.f32 %v714_v41  ;;  %v1635_v4 = vadd.f32 %v1545_v24, %v623_v50  ;;  %v710_v6 = vmul.f32 1.442695, %v673_v47  ;;  %v1086_v37 = vpop.f32.mrf.mxu0 }
 0x102   : > { %v1201_v61 = vpop.eup %1200  ;;  %1220 = vrcp.f32 %v766_v52  ;;  %v764_v0 = vadd.f32 1.0, %v1199_v56  ;;  %v678_v7 = vsub.f32 0.0, %v1629_v53  ;;  %v1639_v9 = vadd.f32 %v1545_v24, %v605_v54  ;;  %v1102_v44 = vpop.f32.mrf.mxu1 }
 0x103   : > { %1222 = vrcp.f32 %v782_v57  ;;  %v780_v3 = vadd.f32 1.0, %v1201_v61  ;;  %v608_v13 = vmul.f32 %v1083_v55, %v1540_v22  ;;  %v624_v14 = vmul.f32 %v1099_v60, %v1540_v22  ;;  %v511_v60 = vpop.f32.mrf.mxu0 }
 0x104   : > { %v1203_v5 = vpop.eup %1202  ;;  %1224 = vrcp.f32 %v764_v0  ;;  %v742_v21 = vmul.f32 1.442695, %v689_v2  ;;  %v1644_v23 = vadd.f32 %v1545_v24, %v621_v58  ;;  %v694_v27 = vsub.f32 0.0, %v1635_v4 }
 0x105   : > { %v1205_v11 = vpop.eup %1204  ;;  %1226 = vrcp.f32 %v780_v3  ;;  %v767_v12 = vadd.f32 1.0, %v1203_v5  ;;  %v1648_v28 = vadd.f32 %v1545_v24, %v608_v13  ;;  %v676_v35 = vsub.f32 0.0, %v1639_v9 }
 0x106   : > { %v1207_v16 = vpop.eup %1206  ;;  %v783_v17 = vadd.f32 1.0, %v1205_v11  ;;  %1228 = vpow2.f32 %v746_v1  ;;  %v606_v36 = vmul.f32 %v1540_v22, %v498_v10  ;;  %v720_v42 = vmul.f32 1.442695, %v678_v7 }
 0x107   : > { %v1209_v25 = vpop.eup %1208  ;;  %1230 = vrcp.f32 %v767_v12  ;;  %v765_v26 = vadd.f32 1.0, %v1207_v16  ;;  %v1654_v43 = vadd.f32 %v1545_v24, %v624_v14  ;;  %v692_v47 = vsub.f32 0.0, %v1644_v23 }
 0x108   : > { %v1211_v29 = vpop.eup %1210  ;;  %1232 = vrcp.f32 %v783_v17  ;;  %v781_v32 = vadd.f32 1.0, %v1209_v25  ;;  %v679_v50 = vsub.f32 0.0, %v1648_v28  ;;  %v1659_v51 = vadd.f32 %v1545_v24, %v606_v36  ;;  %v1087_v25 = vpop.f32.mrf.mxu0 }
 0x109   : > { %v1213_v40 = vpop.eup %1212  ;;  %1234 = vrcp.f32 %v765_v26  ;;  %v770_v41 = vadd.f32 1.0, %v1211_v29  ;;  %v622_v52 = vmul.f32 %v1540_v22, %v562_v15  ;;  %v611_v54 = vmul.f32 %v1086_v37, %v1540_v22 }
 0x10a   : > { %1236 = vrcp.f32 %v781_v32  ;;  %v786_v46 = vadd.f32 1.0, %v1213_v40  ;;  %v752_v56 = vmul.f32 1.442695, %v694_v27  ;;  %v716_v57 = vmul.f32 1.442695, %v676_v35 }
 0x10b   : > { %1238 = vrcp.f32 %v770_v41  ;;  %v627_v58 = vmul.f32 %v1102_v44, %v1540_v22  ;;  %v695_v1 = vsub.f32 0.0, %v1654_v43  ;;  %v1670_v2 = vadd.f32 %v1545_v24, %v622_v52 }
 0x10c   : > { %v1215_v55 = vpop.eup %1214  ;;  %1240 = vrcp.f32 %v786_v46  ;;  %v748_v7 = vmul.f32 1.442695, %v692_v47  ;;  %v1673_v10 = vadd.f32 %v1545_v24, %v611_v54  ;;  %v722_v13 = vmul.f32 1.442695, %v679_v50 }
 0x10d   : > { %v1217_v61 = vpop.eup %1216  ;;  %v768_v0 = vadd.f32 1.0, %v1215_v55  ;;  %1242 = vpow2.f32 %v710_v6  ;;  %v677_v14 = vsub.f32 0.0, %v1659_v51  ;;  %v575_v6 = vpop.f32.mrf.mxu1  ;;  %v1678_v17 = vadd.f32 %v1545_v24, %v627_v58 }
 0x10e   : > { %v1219_v3 = vpop.eup %1218  ;;  %v784_v5 = vadd.f32 1.0, %v1217_v61  ;;  %1244 = vpow2.f32 %v742_v21  ;;  %v609_v21 = vmul.f32 %v1540_v22, %v511_v60  ;;  %v754_v29 = vmul.f32 1.442695, %v695_v1 }
 0x10f   : > { %v1221_v11 = vpop.eup %1220  ;;  %1246 = vrcp.f32 %v768_v0  ;;  %v771_v12 = vadd.f32 1.0, %v1219_v3  ;;  %v693_v32 = vsub.f32 0.0, %v1670_v2  ;;  %v682_v36 = vsub.f32 0.0, %v1673_v10  ;;  %v1103_v46 = vpop.f32.mrf.mxu1 }
 0x110   : > { %v1223_v15 = vpop.eup %1222  ;;  %v830_v16 = vmul.f32 %v1221_v11, %v1550_v30  ;;  %1248 = vrcp.f32 %v784_v5  ;;  %v1690_v37 = vadd.f32 %v1545_v24, %v609_v21  ;;  %v625_v41 = vmul.f32 %v1540_v22, %v575_v6  ;;  %v514_v6 = vpop.f32.mrf.mxu0 }
 0x111   : > { %v1225_v26 = vpop.eup %1224  ;;  %v846_v27 = vmul.f32 %v1223_v15, %v1553_v31  ;;  %1250 = vrcp.f32 %v771_v12  ;;  %v612_v44 = vmul.f32 %v1087_v25, %v1540_v22  ;;  %v698_v50 = vsub.f32 0.0, %v1678_v17  ;;  %v578_v25 = vpop.f32.mrf.mxu1 }
 0x112   : > { %v1227_v35 = vpop.eup %1226  ;;  %862 = vst [vmem:[%s1684_s8 + $0x10] sm:$0xff] %v830_v16  ;;  %v828_v30 = vmul.f32 %v1225_v26, %v1560_v38  ;;  %1252 = vpow2.f32 %v720_v42  ;;  %v718_v42 = vmul.f32 1.442695, %v677_v14  ;;  %v628_v60 = vmul.f32 %v1103_v46, %v1540_v22 }
 0x113   : > { %v1229_v31 = vpop.eup %1228  ;;  %878 = vst [vmem:[%s1684_s8 + $0x90] sm:$0xff] %v846_v27  ;;  %v844_v40 = vmul.f32 %v1227_v35, %v1563_v39  ;;  %1254 = vpow2.f32 %v752_v56  ;;  %v1701_v39 = vadd.f32 %v1545_v24, %v625_v41  ;;  %v1704_v55 = vadd.f32 %v1545_v24, %v612_v44 }
 0x114   : > { %v1231_v47 = vpop.eup %1230  ;;  %860 = vst [vmem:[%s1684_s8] sm:$0xff] %v828_v30  ;;  %v787_v38 = vadd.f32 1.0, %v1229_v31  ;;  %1256 = vpow2.f32 %v716_v57  ;;  %v750_v57 = vmul.f32 1.442695, %v693_v32  ;;  %v728_v0 = vmul.f32 1.442695, %v682_v36 }
 0x115   : > { %v1233_v52 = vpop.eup %1232  ;;  %876 = vst [vmem:[%s1684_s8 + $0x80] sm:$0xff] %v844_v40  ;;  %v831_v54 = vmul.f32 %v1231_v47, %v1570_v48  ;;  %1258 = vpow2.f32 %v748_v7  ;;  %v680_v1 = vsub.f32 0.0, %v1690_v37  ;;  %v696_v7 = vsub.f32 0.0, %v1701_v39 }
 0x116   : > { %v1235_v56 = vpop.eup %1234  ;;  %v847_v58 = vmul.f32 %v1233_v52, %v1573_v49  ;;  %1260 = vrcp.f32 %v787_v38  ;;  %v760_v49 = vmul.f32 1.442695, %v698_v50  ;;  %v610_v35 = vmul.f32 %v1540_v22, %v514_v6 }
 0x117   : > { %v1237_v61 = vpop.eup %1236  ;;  %863 = vst [vmem:[%s1684_s8 + $0x18] sm:$0xff] %v831_v54  ;;  %v829_v48 = vmul.f32 %v1235_v56, %v1581_v59  ;;  %1262 = vpow2.f32 %v722_v13  ;;  %v683_v59 = vsub.f32 0.0, %v1704_v55  ;;  %v724_v21 = vmul.f32 1.442695, %v680_v1 }
 0x118   : > { %v1239_v3 = vpop.eup %1238  ;;  %879 = vst [vmem:[%s1684_s8 + $0x98] sm:$0xff] %v847_v58  ;;  %v845_v5 = vmul.f32 %v1237_v61, %v1584_v62  ;;  %1264 = vpow2.f32 %v754_v29  ;;  %v1720_v62 = vadd.f32 %v1545_v24, %v628_v60  ;;  %v756_v27 = vmul.f32 1.442695, %v696_v7 }
 0x119   : > { %v1241_v11 = vpop.eup %1240  ;;  %861 = vst [vmem:[%s1684_s8 + $0x8] sm:$0xff] %v829_v48  ;;  %v834_v12 = vmul.f32 %v1239_v3, %v1587_v63  ;;  %1266 = vpow2.f32 %v718_v42  ;;  %v730_v32 = vmul.f32 1.442695, %v683_v59  ;;  %v626_v40 = vmul.f32 %v1540_v22, %v578_v25 }
 0x11a   : > { %v1243_v13 = vpop.eup %1242  ;;  %877 = vst [vmem:[%s1684_s8 + $0x88] sm:$0xff] %v845_v5  ;;  %v850_v14 = vmul.f32 %v1241_v11, %v1594_v8  ;;  %1268 = vpow2.f32 %v750_v57  ;;  %v699_v31 = vsub.f32 0.0, %v1720_v62 }
 0x11b   : > { %v1245_v15 = vpop.eup %1244  ;;  %866 = vst [vmem:[%s1684_s8 + $0x30] sm:$0xff] %v834_v12  ;;  %v769_v16 = vadd.f32 1.0, %v1243_v13  ;;  %1270 = vpow2.f32 %v728_v0  ;;  %v1737_v52 = vadd.f32 %v1545_v24, %v626_v40 }
 0x11c   : > { %v1247_v63 = vpop.eup %1246  ;;  %882 = vst [vmem:[%s1684_s8 + $0xb0] sm:$0xff] %v850_v14  ;;  %v785_v26 = vadd.f32 1.0, %v1245_v15  ;;  %1272 = vpow2.f32 %v760_v49  ;;  %v762_v50 = vmul.f32 1.442695, %v699_v31 }
 0x11d   : > { %v1249_v29 = vpop.eup %1248  ;;  %v832_v8 = vmul.f32 %v1247_v63, %v1601_v18  ;;  %1274 = vrcp.f32 %v769_v16  ;;  %v697_v1 = vsub.f32 0.0, %v1737_v52 }
 0x11e   : > { %v1251_v30 = vpop.eup %1250  ;;  %v848_v36 = vmul.f32 %v1249_v29, %v1604_v19  ;;  %1276 = vrcp.f32 %v785_v26  ;;  %v1734_v19 = vadd.f32 %v1545_v24, %v610_v35 }
 0x11f   : > { %v1253_v41 = vpop.eup %1252  ;;  %864 = vst [vmem:[%s1684_s8 + $0x20] sm:$0xff] %v832_v8  ;;  %v835_v44 = vmul.f32 %v1251_v30, %v1607_v20  ;;  %1278 = vpow2.f32 %v724_v21  ;;  %v758_v13 = vmul.f32 1.442695, %v697_v1 }
 0x120   : > { %v1255_v46 = vpop.eup %1254  ;;  %880 = vst [vmem:[%s1684_s8 + $0xa0] sm:$0xff] %v848_v36  ;;  %v774_v18 = vadd.f32 1.0, %v1253_v41  ;;  %1280 = vpow2.f32 %v756_v27  ;;  %v681_v61 = vsub.f32 0.0, %v1734_v19 }
 0x121   : > { %v1257_v47 = vpop.eup %1256  ;;  %867 = vst [vmem:[%s1684_s8 + $0x38] sm:$0xff] %v835_v44  ;;  %v790_v38 = vadd.f32 1.0, %v1255_v46  ;;  %1282 = vpow2.f32 %v730_v32 }
 0x122   : > { %v1259_v42 = vpop.eup %1258  ;;  %1284 = vrcp.f32 %v774_v18  ;;  %v772_v22 = vadd.f32 1.0, %v1257_v47  ;;  %v726_v11 = vmul.f32 1.442695, %v681_v61 }
 0x123   : > { %v1261_v20 = vpop.eup %1260  ;;  %1286 = vrcp.f32 %v790_v38  ;;  %v788_v54 = vadd.f32 1.0, %v1259_v42 }
 0x124   : > { %v1263_v56 = vpop.eup %1262  ;;  %v851_v58 = vmul.f32 %v1261_v20, %v1615_v33  ;;  %1288 = vrcp.f32 %v772_v22 }
 0x125   : > { %v1265_v57 = vpop.eup %1264  ;;  %1290 = vrcp.f32 %v788_v54  ;;  %v775_v60 = vadd.f32 1.0, %v1263_v56 }
 0x126   : > { %v1267_v48 = vpop.eup %1266  ;;  %883 = vst [vmem:[%s1684_s8 + $0xb8] sm:$0xff] %v851_v58  ;;  %v791_v0 = vadd.f32 1.0, %v1265_v57  ;;  %1292 = vpow2.f32 %v762_v50 }
 0x127   : > { %v1269_v24 = vpop.eup %1268  ;;  %1294 = vrcp.f32 %v775_v60  ;;  %v773_v3 = vadd.f32 1.0, %v1267_v48 }
 0x128   : > { %v1271_v5 = vpop.eup %1270  ;;  %1296 = vrcp.f32 %v791_v0  ;;  %v789_v49 = vadd.f32 1.0, %v1269_v24 }
 0x129   : > { %v1273_v33 = vpop.eup %1272  ;;  %1298 = vrcp.f32 %v773_v3  ;;  %v778_v7 = vadd.f32 1.0, %v1271_v5 }
 0x12a   : > { %v1275_v12 = vpop.eup %1274  ;;  %1300 = vrcp.f32 %v789_v49  ;;  %v794_v59 = vadd.f32 1.0, %v1273_v33 }
 0x12b   : > { %v1277_v14 = vpop.eup %1276  ;;  %v833_v6 = vmul.f32 %v1275_v12, %v1618_v34  ;;  %1302 = vrcp.f32 %v778_v7 }
 0x12c   : > { %v1279_v15 = vpop.eup %1278  ;;  %v849_v16 = vmul.f32 %v1277_v14, %v1624_v45  ;;  %1304 = vrcp.f32 %v794_v59 }
 0x12d   : > { %v1281_v21 = vpop.eup %1280  ;;  %865 = vst [vmem:[%s1684_s8 + $0x28] sm:$0xff] %v833_v6  ;;  %v776_v25 = vadd.f32 1.0, %v1279_v15  ;;  %1306 = vpow2.f32 %v726_v11 }
 0x12e   : > { %v1283_v63 = vpop.eup %1282  ;;  %881 = vst [vmem:[%s1684_s8 + $0xa8] sm:$0xff] %v849_v16  ;;  %v792_v26 = vadd.f32 1.0, %v1281_v21  ;;  %1308 = vpow2.f32 %v758_v13 }
 0x12f   : > { %v1285_v27 = vpop.eup %1284  ;;  %1310 = vrcp.f32 %v776_v25  ;;  %v779_v29 = vadd.f32 1.0, %v1283_v63 }
 0x130   : > { %v1287_v34 = vpop.eup %1286  ;;  %v838_v8 = vmul.f32 %v1285_v27, %v1629_v53  ;;  %1312 = vrcp.f32 %v792_v26 }
 0x131   : > { %v1289_v45 = vpop.eup %1288  ;;  %v854_v32 = vmul.f32 %v1287_v34, %v1635_v4  ;;  %1314 = vrcp.f32 %v779_v29 }
 0x132   : > { %v1291_v35 = vpop.eup %1290  ;;  %870 = vst [vmem:[%s1684_s8 + $0x50] sm:$0xff] %v838_v8  ;;  %v836_v30 = vmul.f32 %v1289_v45, %v1639_v9 }
 0x133   : > { %v1293_v36 = vpop.eup %1292  ;;  %886 = vst [vmem:[%s1684_s8 + $0xd0] sm:$0xff] %v854_v32  ;;  %v852_v31 = vmul.f32 %v1291_v35, %v1644_v23 }
 0x134   : > { %v1295_v40 = vpop.eup %1294  ;;  %868 = vst [vmem:[%s1684_s8 + $0x40] sm:$0xff] %v836_v30  ;;  %v795_v41 = vadd.f32 1.0, %v1293_v36 }
 0x135   : > { %v1297_v53 = vpop.eup %1296  ;;  %884 = vst [vmem:[%s1684_s8 + $0xc0] sm:$0xff] %v852_v31  ;;  %v839_v4 = vmul.f32 %v1295_v40, %v1648_v28 }
 0x136   : > { %v1299_v44 = vpop.eup %1298  ;;  %v855_v46 = vmul.f32 %v1297_v53, %v1654_v43  ;;  %1316 = vrcp.f32 %v795_v41 }
 0x137   : > { %v1301_v9 = vpop.eup %1300  ;;  %871 = vst [vmem:[%s1684_s8 + $0x58] sm:$0xff] %v839_v4  ;;  %v837_v18 = vmul.f32 %v1299_v44, %v1659_v51 }
 0x138   : > { %v1303_v23 = vpop.eup %1302  ;;  %887 = vst [vmem:[%s1684_s8 + $0xd8] sm:$0xff] %v855_v46  ;;  %v853_v47 = vmul.f32 %v1301_v9, %v1670_v2 }
 0x139   : > { %v1305_v38 = vpop.eup %1304  ;;  %869 = vst [vmem:[%s1684_s8 + $0x48] sm:$0xff] %v837_v18  ;;  %v842_v42 = vmul.f32 %v1303_v23, %v1673_v10 }
 0x13a   : > { %v1307_v28 = vpop.eup %1306  ;;  %885 = vst [vmem:[%s1684_s8 + $0xc8] sm:$0xff] %v853_v47  ;;  %v858_v43 = vmul.f32 %v1305_v38, %v1678_v17 }
 0x13b   : > { %v1309_v22 = vpop.eup %1308  ;;  %874 = vst [vmem:[%s1684_s8 + $0x70] sm:$0xff] %v842_v42  ;;  %v777_v50 = vadd.f32 1.0, %v1307_v28 }
 0x13c   : > { %v1311_v51 = vpop.eup %1310  ;;  %890 = vst [vmem:[%s1684_s8 + $0xf0] sm:$0xff] %v858_v43  ;;  %v793_v2 = vadd.f32 1.0, %v1309_v22 }
 0x13d   : > { %v1313_v20 = vpop.eup %1312  ;;  %v840_v54 = vmul.f32 %v1311_v51, %v1690_v37  ;;  %1318 = vrcp.f32 %v777_v50 }
 0x13e   : > { %v1315_v10 = vpop.eup %1314  ;;  %v856_v56 = vmul.f32 %v1313_v20, %v1701_v39  ;;  %1320 = vrcp.f32 %v793_v2 }
 0x13f   : > { %872 = vst [vmem:[%s1684_s8 + $0x60] sm:$0xff] %v840_v54  ;;  %v843_v17 = vmul.f32 %v1315_v10, %v1704_v55 }
 0x140   : > { %888 = vst [vmem:[%s1684_s8 + $0xe0] sm:$0xff] %v856_v56 }
 0x141   : > { %875 = vst [vmem:[%s1684_s8 + $0x78] sm:$0xff] %v843_v17 }
 0x143   : > { %v1317_v58 = vpop.eup %1316 }
 0x144   : > { %v859_v57 = vmul.f32 %v1317_v58, %v1720_v62 }
 0x146   : > { %891 = vst [vmem:[%s1684_s8 + $0xf8] sm:$0xff] %v859_v57 }
 0x14a   : > { %v1319_v37 = vpop.eup %1318 }
 0x14b   : > { %v1321_v60 = vpop.eup %1320  ;;  %v841_v39 = vmul.f32 %v1319_v37, %v1734_v19 }
 0x14c   : > { %v857_v55 = vmul.f32 %v1321_v60, %v1737_v52 }
 0x14d   : > { %873 = vst [vmem:[%s1684_s8 + $0x68] sm:$0xff] %v841_v39 }
 0x14e   : > { %889 = vst [vmem:[%s1684_s8 + $0xe8] sm:$0xff] %v857_v55 }
 0x14f   : > { %1335 = shalt.err (!%p1332_p5)
}
 0x150   : > { %s1336_s26 = scalar_lea.hbm %s1781_s13, 4096  ;;  %s1340_s5 = scalar_lea.hbm %s1839_s4, 8192 }
 0x151   : > { %p1337_p6 = scmp.ne.s32.totalorder %s1781_s13, %s1336_s26  ;;  %p1341_p10 = scmp.lt.s32.totalorder %s1781_s13, %s1839_s4 }
 0x152   : > { %p1342_p11 = scmp.lt.s32.totalorder %s1340_s5, %s1336_s26 }
 0x153   : > { %p1338_p7 = pnand %p1337_p6, %p1468_p4 }
 0x154   : > { %p1343_p12 = por %p1342_p11, %p1341_p10 }
 0x155   : > { %p1339_p9 = pneg %p1338_p7 }
 0x157   : > { %p1344_p13 = pnand %p1343_p12, %p1339_p9 }
 0x159   : > { %1347 = shalt.err (!%p1344_p13)
}
 0x15a   : > { %s1401_s8 = smov 128   ;;  %s1402_s9 = smov 8  }
 0x15b   : > { %1116 = dma.vmem_to_hbm [thread:$0]  (%p1468_p4), %s1783_s10, 4096, %s1781_s13, %s1790_s18, %s1401_s8, %s1401_s8, %s1402_s9  }
 0x15c PF: > { %p1122_p0 = scmp.ge.s32.totalorder %s1398_s20, 2  ;;  %s923_s11 = sand.u32 1, %s1378_s15  }
 0x15d   : > { %s924_s12 = scalar_lea.sflag [#allocation3], %s923_s11 }
 0x15e   : > { %p1119_p1 = pnand %p1122_p0, %p1475_p8 }
 0x160   : > { %p1120_p2 = pneg %p1119_p1 }
 0x162   : > { %1373 = dma.done.wait (%p1120_p2), %s924_s12, 4096  }
 0x163   : > { %1375 = vsyncadd (%p1120_p2), %s924_s12, 4294963200  ;;  %s17_s20 = sadd.s32 1, %s1398_s20   ;;  %s1842_s15 = smov %s1382_s16 }
 0x164   : > { %p14_p3 = scmp.ge.s32.totalorder %s17_s20, 4   ;;  %s1843_s16 = smov %s1386_s17 }
 0x165   : > { %s1844_s17 = smov %s1481_s28  ;;  %s1845_s18 = smov %s1394_s19 }
 0x166   : > { %s1846_s19 = smov %s1848_s23  ;;  %16 = sbr.rel (!%p14_p3) target bundleno = 4 (0x4), region = 71 }
 0x16b   :  { %929 = vsyncpa [#allocation3], 1 }
 0x16c   :  { %931 = vsyncpa [#allocation3 + $0x1], 1 }

</bundles_post_ra>
